<compile_context>
chip_gen: v7x
topology: tpu7x:2x2x1
jax: 0.10.0
libtpu: 0.0.40
codegen_flags: <defaults>
</compile_context>

<pallas_src>
import jax
import jax.numpy as jnp
from jax.experimental import pallas as pl
from jax.experimental.pallas import tpu as pltpu


def _round_up(n: int, m: int) -> int:
    return ((n + m - 1) // m) * m


def mlp_kernel(x_ref, w1_ref, b1_ref, w2_ref, b2_ref, w3_ref, b3_ref, o_ref):
    cdt = w1_ref.dtype                      # MXU operand dtype (f32 or bf16)
    x = x_ref[...].astype(cdt)              # in-kernel cast: no extra HBM pass
    # Layer 1: Linear(768 -> 256) + ReLU   (Dropout = identity in eval)
    h1 = jnp.dot(x, w1_ref[...], preferred_element_type=jnp.float32)
    h1 = jnp.maximum(h1 + b1_ref[...], 0.0).astype(cdt)
    # Layer 2: Linear(256 -> 128) + ReLU   (Dropout = identity in eval)
    h2 = jnp.dot(h1, w2_ref[...], preferred_element_type=jnp.float32)
    h2 = jnp.maximum(h2 + b2_ref[...], 0.0).astype(cdt)
    # Layer 3: Linear(128 -> C_pad)  (columns >= num_classes are zero-padded)
    out = jnp.dot(h2, w3_ref[...], preferred_element_type=jnp.float32)
    o_ref[...] = (out + b3_ref[...]).astype(o_ref.dtype)


def prepare_params(params, *, compute_dtype=jnp.float32):
    """One-time param prep (hoisted out of the forward path):
       lane-pad W3/b3 to a multiple of 128 output columns and cast weights to the
       MXU compute dtype.  Biases stay f32 (added to f32 accumulators)."""
    w1, b1, w2, b2, w3, b3 = params
    C = w3.shape[1]
    C_pad = _round_up(max(C, 128), 128)
    w3p = jnp.zeros((w3.shape[0], C_pad), dtype=w3.dtype).at[:, :C].set(w3)
    b3p = jnp.zeros((1, C_pad), dtype=b3.dtype).at[:, :C].set(b3)
    return (
        w1.astype(compute_dtype),
        b1.astype(jnp.float32),
        w2.astype(compute_dtype),
        b2.astype(jnp.float32),
        w3p.astype(compute_dtype),
        b3p.astype(jnp.float32),
        C,
    )


def geospatial_downstream_task(x, prepared, *, block_b=None):
    """x: (B, input_dim).  prepared: output of prepare_params().
       Returns logits (B, num_classes) in x.dtype."""
    w1, b1, w2, b2, w3p, b3p, C = prepared
    B, D = x.shape
    H1 = w1.shape[1]
    H2 = w2.shape[1]
    C_pad = w3p.shape[1]

    # ---- batch tile selection ----
    ROW_ALIGN = 16            # multiple of 8 (f32 sublanes) and 16 (bf16 packing)
    MAX_BLOCK_B = 2048        # amortizes ~0.35 us/step; fits with vmem_limit below
    if block_b is None:
        if B <= 2 * ROW_ALIGN:
            block_b = _round_up(B, ROW_ALIGN)       # tiny batch: single step
        else:
            # >= 2 grid steps so v7x's 2 TensorCores both get work
            block_b = min(MAX_BLOCK_B, _round_up(pl.cdiv(B, 2), ROW_ALIGN))
    else:
        block_b = min(MAX_BLOCK_B, _round_up(block_b, ROW_ALIGN))

    # Ragged grid: no wrapper-side padding of x.  Pallas pads the last input
    # tile and masks the last output tile's writeback.
    grid = (pl.cdiv(B, block_b),)

    out = pl.pallas_call(
        mlp_kernel,
        out_shape=jax.ShapeDtypeStruct((B, C_pad), x.dtype),
        grid=grid,
        in_specs=[
            pl.BlockSpec((block_b, D), lambda i: (i, 0)),   # x tile (batch-tiled)
            pl.BlockSpec((D, H1), lambda i: (0, 0)),        # W1 (full, resident)
            pl.BlockSpec((1, H1), lambda i: (0, 0)),        # b1
            pl.BlockSpec((H1, H2), lambda i: (0, 0)),       # W2
            pl.BlockSpec((1, H2), lambda i: (0, 0)),        # b2
            pl.BlockSpec((H2, C_pad), lambda i: (0, 0)),    # W3 (lane-dense padded)
            pl.BlockSpec((1, C_pad), lambda i: (0, 0)),     # b3
        ],
        out_specs=pl.BlockSpec((block_b, C_pad), lambda i: (i, 0)),
        compiler_params=pltpu.CompilerParams(
            dimension_semantics=("parallel",),              # shard over v7x's 2 TCs
            vmem_limit_bytes=48 * 1024 * 1024,              # 2048-row f32 tiles fit
        ),
    )(x, w1, b1, w2, b2, w3p, b3p)

    # Strip the lane-padding columns only (no batch padding anymore).
    return out[:, :C]


def init_params(key, input_dim=768, num_classes=5):
    """Deterministic synthetic init mirroring the nn.Linear shapes."""
    dims = [(input_dim, 256), (256, 128), (128, num_classes)]
    params = []
    for i, (fan_in, fan_out) in enumerate(dims):
        kw, kb = jax.random.split(jax.random.fold_in(key, i))
        bound = 1.0 / jnp.sqrt(fan_in)
        w = jax.random.uniform(kw, (fan_in, fan_out), jnp.float32, -bound, bound)
        b = jax.random.uniform(kb, (1, fan_out), jnp.float32, -bound, bound)
        params += [w, b]
    return tuple(params)


def reference_forward(x, params):
    w1, b1, w2, b2, w3, b3 = params
    h = jnp.maximum(x @ w1 + b1, 0.0)
    h = jnp.maximum(h @ w2 + b2, 0.0)
    return h @ w3 + b3


if __name__ == "__main__":
    key = jax.random.PRNGKey(0)
    input_dim, num_classes = 768, 5

    params = init_params(key, input_dim=input_dim, num_classes=num_classes)

    # One-time prep (hoisted out of the forward path).
    prep_f32 = prepare_params(params, compute_dtype=jnp.float32)
    prep_bf16 = prepare_params(params, compute_dtype=jnp.bfloat16)

    # --- small batch (B=16): single grid step, f32 operands, tight check ---
    x = jax.random.normal(jax.random.fold_in(key, 100), (16, input_dim), jnp.float32)
    ref = reference_forward(x, params)

    out_f32 = jax.block_until_ready(geospatial_downstream_task(x, prep_f32))
    assert out_f32.shape == (16, num_classes)
    assert jnp.allclose(out_f32, ref, atol=1e-4, rtol=1e-4), "f32 mismatch vs reference"

    # --- bf16-weight path (x cast in-kernel, f32 accumulation): looser tolerance ---
    out_bf16 = jax.block_until_ready(geospatial_downstream_task(x, prep_bf16))
    assert out_bf16.shape == (16, num_classes)
    assert jnp.allclose(out_bf16, ref, atol=1e-1, rtol=1e-1), "bf16 mismatch vs reference"

    # --- non-aligned batch (B=200): ragged last block + 2-step grid path ---
    x2 = jax.random.normal(jax.random.fold_in(key, 200), (200, input_dim), jnp.float32)
    ref2 = reference_forward(x2, params)
    out2 = jax.block_until_ready(geospatial_downstream_task(x2, prep_f32))
    assert out2.shape == (200, num_classes)
    assert jnp.allclose(out2, ref2, atol=1e-4, rtol=1e-4), "ragged-batch mismatch"

    print("KERNEL_OK")
</pallas_src>

<mosaic_0001>
module attributes {stable_mosaic.version = 11 : i64} {
  func.func @mlp_kernel(%arg0: i32, %arg1: memref<16x768xf32, #tpu.memory_space<vmem>>, %arg2: memref<768x256xf32, #tpu.memory_space<vmem>>, %arg3: memref<1x256xf32, #tpu.memory_space<vmem>>, %arg4: memref<256x128xf32, #tpu.memory_space<vmem>>, %arg5: memref<1x128xf32, #tpu.memory_space<vmem>>, %arg6: memref<128x128xf32, #tpu.memory_space<vmem>>, %arg7: memref<1x128xf32, #tpu.memory_space<vmem>>, %arg8: memref<16x128xf32, #tpu.memory_space<vmem>>) attributes {dimension_semantics = [#tpu.dimension_semantics<parallel>], iteration_bounds = array<i64: 1>, scalar_prefetch = 0 : i64, scratch_operands = 0 : i64, tpu.core_type = #tpu.core_type<tc>, window_params = [{transform_indices = @transform_0, window_bounds = array<i64: 16, 768>}, {pipeline_mode = #tpu.pipeline_mode<synchronous>, transform_indices = @transform_1, window_bounds = array<i64: 768, 256>}, {pipeline_mode = #tpu.pipeline_mode<synchronous>, transform_indices = @transform_2, window_bounds = array<i64: 1, 256>}, {pipeline_mode = #tpu.pipeline_mode<synchronous>, transform_indices = @transform_3, window_bounds = array<i64: 256, 128>}, {pipeline_mode = #tpu.pipeline_mode<synchronous>, transform_indices = @transform_4, window_bounds = array<i64: 1, 128>}, {pipeline_mode = #tpu.pipeline_mode<synchronous>, transform_indices = @transform_5, window_bounds = array<i64: 128, 128>}, {pipeline_mode = #tpu.pipeline_mode<synchronous>, transform_indices = @transform_6, window_bounds = array<i64: 1, 128>}, {transform_indices = @transform_7, window_bounds = array<i64: 16, 128>}]} {
    %c0 = arith.constant 0 : index
    %c0_0 = arith.constant 0 : index
    %0 = vector.load %arg1[%c0, %c0_0] : memref<16x768xf32, #tpu.memory_space<vmem>>, vector<16x768xf32>
    %c0_1 = arith.constant 0 : index
    %c0_2 = arith.constant 0 : index
    %1 = vector.load %arg2[%c0_1, %c0_2] : memref<768x256xf32, #tpu.memory_space<vmem>>, vector<768x256xf32>
    %cst = arith.constant dense<0.000000e+00> : vector<16x256xf32>
    %2 = tpu.matmul %0, %1, %cst {dimension_numbers = #tpu.dot_dimension_numbers<[1], [0], [0], [1], [0, 0, 1, 1], [], []>} : vector<16x768xf32>, vector<768x256xf32>, vector<16x256xf32> -> vector<16x256xf32>
    %c0_3 = arith.constant 0 : index
    %c0_4 = arith.constant 0 : index
    %3 = vector.load %arg3[%c0_3, %c0_4] : memref<1x256xf32, #tpu.memory_space<vmem>>, vector<1x256xf32>
    %4 = vector.broadcast %3 : vector<1x256xf32> to vector<16x256xf32>
    %5 = arith.addf %2, %4 : vector<16x256xf32>
    %cst_5 = arith.constant 0.000000e+00 : f32
    %6 = vector.broadcast %cst_5 : f32 to vector<16x256xf32>
    %7 = arith.maximumf %5, %6 : vector<16x256xf32>
    %c0_6 = arith.constant 0 : index
    %c0_7 = arith.constant 0 : index
    %8 = vector.load %arg4[%c0_6, %c0_7] : memref<256x128xf32, #tpu.memory_space<vmem>>, vector<256x128xf32>
    %cst_8 = arith.constant dense<0.000000e+00> : vector<16x128xf32>
    %9 = tpu.matmul %7, %8, %cst_8 {dimension_numbers = #tpu.dot_dimension_numbers<[1], [0], [0], [1], [0, 0, 1, 1], [], []>} : vector<16x256xf32>, vector<256x128xf32>, vector<16x128xf32> -> vector<16x128xf32>
    %c0_9 = arith.constant 0 : index
    %c0_10 = arith.constant 0 : index
    %10 = vector.load %arg5[%c0_9, %c0_10] : memref<1x128xf32, #tpu.memory_space<vmem>>, vector<1x128xf32>
    %11 = vector.broadcast %10 : vector<1x128xf32> to vector<16x128xf32>
    %12 = arith.addf %9, %11 : vector<16x128xf32>
    %cst_11 = arith.constant 0.000000e+00 : f32
    %13 = vector.broadcast %cst_11 : f32 to vector<16x128xf32>
    %14 = arith.maximumf %12, %13 : vector<16x128xf32>
    %c0_12 = arith.constant 0 : index
    %c0_13 = arith.constant 0 : index
    %15 = vector.load %arg6[%c0_12, %c0_13] : memref<128x128xf32, #tpu.memory_space<vmem>>, vector<128x128xf32>
    %cst_14 = arith.constant dense<0.000000e+00> : vector<16x128xf32>
    %16 = tpu.matmul %14, %15, %cst_14 {dimension_numbers = #tpu.dot_dimension_numbers<[1], [0], [0], [1], [0, 0, 1, 1], [], []>} : vector<16x128xf32>, vector<128x128xf32>, vector<16x128xf32> -> vector<16x128xf32>
    %c0_15 = arith.constant 0 : index
    %c0_16 = arith.constant 0 : index
    %17 = vector.load %arg7[%c0_15, %c0_16] : memref<1x128xf32, #tpu.memory_space<vmem>>, vector<1x128xf32>
    %18 = vector.broadcast %17 : vector<1x128xf32> to vector<16x128xf32>
    %19 = arith.addf %16, %18 : vector<16x128xf32>
    %c0_17 = arith.constant 0 : index
    %c0_18 = arith.constant 0 : index
    %20 = vector.load %arg8[%c0_17, %c0_18] : memref<16x128xf32, #tpu.memory_space<vmem>>, vector<16x128xf32>
    tpu.vector_store %arg8[%c0_17, %c0_18], %19 {strides = array<i32>} : memref<16x128xf32, #tpu.memory_space<vmem>>, vector<16x128xf32>,
    return
  }
  func.func @transform_0(%arg0: i32) -> (i32, i32) {
    %c0_i32 = arith.constant 0 : i32
    %c0_i32_0 = arith.constant 0 : i32
    return %arg0, %c0_i32 : i32, i32
  }
  func.func @transform_1(%arg0: i32) -> (i32, i32) {
    %c0_i32 = arith.constant 0 : i32
    %c0_i32_0 = arith.constant 0 : i32
    %c0_i32_1 = arith.constant 0 : i32
    return %c0_i32, %c0_i32_0 : i32, i32
  }
  func.func @transform_2(%arg0: i32) -> (i32, i32) {
    %c0_i32 = arith.constant 0 : i32
    %c0_i32_0 = arith.constant 0 : i32
    %c0_i32_1 = arith.constant 0 : i32
    return %c0_i32, %c0_i32_0 : i32, i32
  }
  func.func @transform_3(%arg0: i32) -> (i32, i32) {
    %c0_i32 = arith.constant 0 : i32
    %c0_i32_0 = arith.constant 0 : i32
    %c0_i32_1 = arith.constant 0 : i32
    return %c0_i32, %c0_i32_0 : i32, i32
  }
  func.func @transform_4(%arg0: i32) -> (i32, i32) {
    %c0_i32 = arith.constant 0 : i32
    %c0_i32_0 = arith.constant 0 : i32
    %c0_i32_1 = arith.constant 0 : i32
    return %c0_i32, %c0_i32_0 : i32, i32
  }
  func.func @transform_5(%arg0: i32) -> (i32, i32) {
    %c0_i32 = arith.constant 0 : i32
    %c0_i32_0 = arith.constant 0 : i32
    %c0_i32_1 = arith.constant 0 : i32
    return %c0_i32, %c0_i32_0 : i32, i32
  }
  func.func @transform_6(%arg0: i32) -> (i32, i32) {
    %c0_i32 = arith.constant 0 : i32
    %c0_i32_0 = arith.constant 0 : i32
    %c0_i32_1 = arith.constant 0 : i32
    return %c0_i32, %c0_i32_0 : i32, i32
  }
  func.func @transform_7(%arg0: i32) -> (i32, i32) {
    %c0_i32 = arith.constant 0 : i32
    %c0_i32_0 = arith.constant 0 : i32
    return %arg0, %c0_i32 : i32, i32
  }
}

</mosaic_0001>

<bundles_post_ra>
// kernel: tpu_custom_call.1
= control target key start
LH: loop header
LB: loop body
LE: loop exit
PB: predicated region body
PF: predicated region fallthrough
CT: control target
= control target key end

     0   :  { %12 = vsyncpa [#allocation3], 0  ;;  %s1387_s0 = inlined_call_operand.hbm [shape: f32[16,768], index: 0, kind: input, shape index: {}]   ;;  %s1388_s1 = inlined_call_operand.hbm [shape: f32[768,256], index: 1, kind: input, shape index: {}]   ;;  %s1389_s2 = inlined_call_operand.vmem [shape: f32[1,256], index: 2, kind: input, shape index: {}]   ;;  %s1390_s3 = inlined_call_operand.hbm [shape: f32[256,128], index: 3, kind: input, shape index: {}]   ;;  %s1391_s4 = inlined_call_operand.vmem [shape: f32[1,128], index: 4, kind: input, shape index: {}]   ;;  %s1392_s5 = inlined_call_operand.hbm [shape: f32[128,128], index: 5, kind: input, shape index: {}]   ;;  %s1393_s6 = inlined_call_operand.vmem [shape: f32[1,128], index: 6, kind: input, shape index: {}]   ;;  %s1394_s7 = inlined_call_operand.hbm [shape: f32[16,128], index: 7, kind: output, shape index: {}]  }
   0x1   :  { %13 = vsyncpa [#allocation6], 0 }
   0x2   :  { %14 = vsyncpa [#allocation9], 0 }
   0x3   :  { %15 = vsyncpa [#allocation4], 0  ;;  %s1258_s24 = smov [#allocation5]   ;;  %s1140_s28 = scalar_lea.hbm %s1388_s1, 24576 }
   0x4   :  { %s33_s25 = sshll.u32 %s1258_s24, 4  ;;  %p1141_p0 = scmp.ne.s32.totalorder %s1388_s1, %s1140_s28  ;;  %s34_s25 = int_to_ptr.vmem [resolvable:$true] %s33_s25 }
   0x5   :  { %p1144_p1 = scmp.lt.u32.totalorder %s1140_s28, %s1388_s1 }
   0x7   :  { %p1146_p2 = pnand %p1144_p1, %p1141_p0 }
   0x9   :  { %1149 = shalt.err (!%p1146_p2)
}
   0xa   :  { %s1150_s10 = scalar_lea.vmem %s34_s25, 24576  ;;  %p1155_p4 = scmp.lt.s32.totalorder %s34_s25, %s34_s25 }
   0xb   :  { %p1151_p3 = scmp.ne.s32.totalorder %s34_s25, %s1150_s10  ;;  %p1156_p5 = scmp.lt.s32.totalorder %s1150_s10, %s1150_s10 }
   0xd   :  { %p1157_p6 = por %p1156_p5, %p1155_p4 }
   0xf   :  { %p1158_p7 = pnand %p1157_p6, %p1151_p3 }
  0x11   :  { %1161 = shalt.err (!%p1158_p7)
}
  0x12   :  { %s1259_s11 = smov 256   ;;  %s1260_s12 = smov 16  }
  0x13   :  { %39 = dma.hbm_to_vmem [thread:$0]  %s1388_s1, 24576, %s34_s25, [#allocation6], %s1259_s11, %s1259_s11, %s1260_s12  }
  0x14   :  { %s1261_s15 = smov [#allocation2]   ;;  %s1162_s19 = scalar_lea.hbm %s1387_s0, 1536 }
  0x15   :  { %s21_s16 = sshll.u32 %s1261_s15, 4  ;;  %p1163_p8 = scmp.ne.s32.totalorder %s1387_s0, %s1162_s19  ;;  %s22_s16 = int_to_ptr.vmem [resolvable:$true] %s21_s16 }
  0x16   :  { %p1166_p9 = scmp.lt.u32.totalorder %s1162_s19, %s1387_s0 }
  0x18   :  { %p1168_p10 = pnand %p1166_p9, %p1163_p8 }
  0x1a   :  { %1171 = shalt.err (!%p1168_p10)
}
  0x1b   :  { %s1172_s24 = scalar_lea.vmem %s22_s16, 1536  ;;  %p1177_p12 = scmp.lt.s32.totalorder %s22_s16, %s22_s16 }
  0x1c   :  { %p1173_p11 = scmp.ne.s32.totalorder %s22_s16, %s1172_s24  ;;  %p1178_p13 = scmp.lt.s32.totalorder %s1172_s24, %s1172_s24 }
  0x1e   :  { %p1179_p0 = por %p1178_p13, %p1177_p12 }
  0x20   :  { %p1180_p1 = pnand %p1179_p0, %p1173_p11 }
  0x22   :  { %1183 = shalt.err (!%p1180_p1)
}
  0x23   :  { %s1262_s1 = smov 768   ;;  %s1263_s25 = smov 48  }
  0x24   :  { %27 = dma.hbm_to_vmem [thread:$0]  %s1387_s0, 1536, %s22_s16, [#allocation3], %s1262_s1, %s1262_s1, %s1263_s25  }
  0x25   :  { %s1264_s28 = smov [#allocation7]   ;;  %s1184_s9 = scalar_lea.hbm %s1390_s3, 4096 }
  0x26   :  { %s47_s29 = sshll.u32 %s1264_s28, 4  ;;  %p1185_p2 = scmp.ne.s32.totalorder %s1390_s3, %s1184_s9  ;;  %s48_s29 = int_to_ptr.vmem [resolvable:$true] %s47_s29 }
  0x27   :  { %p1188_p3 = scmp.lt.u32.totalorder %s1184_s9, %s1390_s3 }
  0x29   :  { %p1190_p4 = pnand %p1188_p3, %p1185_p2 }
  0x2b   :  { %1193 = shalt.err (!%p1190_p4)
}
  0x2c   :  { %s1194_s14 = scalar_lea.vmem %s48_s29, 4096  ;;  %p1199_p6 = scmp.lt.s32.totalorder %s48_s29, %s48_s29 }
  0x2d   :  { %p1195_p5 = scmp.ne.s32.totalorder %s48_s29, %s1194_s14  ;;  %p1200_p7 = scmp.lt.s32.totalorder %s1194_s14, %s1194_s14 }
  0x2f   :  { %p1201_p8 = por %p1200_p7, %p1199_p6 }
  0x31   :  { %p1202_p9 = pnand %p1201_p8, %p1195_p5 }
  0x33   :  { %1205 = shalt.err (!%p1202_p9)
}
  0x34   :  { %s1265_s0 = smov 128   ;;  %s1266_s15 = smov 8  }
  0x35   :  { %53 = dma.hbm_to_vmem [thread:$0]  %s1390_s3, 4096, %s48_s29, [#allocation6], %s1265_s0, %s1265_s0, %s1266_s15  }
  0x36   :  { %s1267_s18 = smov [#allocation8]   ;;  %s1206_s22 = scalar_lea.hbm %s1392_s5, 2048 }
  0x37   :  { %s61_s19 = sshll.u32 %s1267_s18, 4  ;;  %p1207_p10 = scmp.ne.s32.totalorder %s1392_s5, %s1206_s22  ;;  %s62_s19 = int_to_ptr.vmem [resolvable:$true] %s61_s19 }
  0x38   :  { %p1210_p11 = scmp.lt.u32.totalorder %s1206_s22, %s1392_s5 }
  0x3a   :  { %p1212_p12 = pnand %p1210_p11, %p1207_p10 }
  0x3c   :  { %1215 = shalt.err (!%p1212_p12)
}
  0x3d   :  { %s1216_s26 = scalar_lea.vmem %s62_s19, 2048  ;;  %p1221_p0 = scmp.lt.s32.totalorder %s62_s19, %s62_s19 }
  0x3e   :  { %p1217_p13 = scmp.ne.s32.totalorder %s62_s19, %s1216_s26  ;;  %p1222_p1 = scmp.lt.s32.totalorder %s1216_s26, %s1216_s26 }
  0x40   :  { %p1223_p2 = por %p1222_p1, %p1221_p0 }
  0x42   :  { %p1224_p3 = pnand %p1223_p2, %p1217_p13 }
  0x44   :  { %1227 = shalt.err (!%p1224_p3)
}
  0x45   :  { %67 = dma.hbm_to_vmem [thread:$0]  %s1392_s5, 2048, %s62_s19, [#allocation9], %s1265_s0, %s1265_s0, %s1266_s15  }
  0x46   :  { %1250 = dma.done.wait [#allocation3], 1536  }
  0x47   :  { %1251 = vsyncadd [#allocation3], 4294965760 }
  0x48   :  { %1252 = dma.done.wait [#allocation6], 28672  }
  0x49   :  { %1253 = vsyncadd [#allocation6], 4294938624 }
  0x4a   :  { %1254 = dma.done.wait [#allocation9], 2048  }
  0x4b   :  { %1255 = vsyncadd [#allocation9], 4294965248  ;;  %v159_v0 = vld [vmem:[#allocation5 + $0x208] sm:$0xff]  ;;  %v161_v1 = vld [vmem:[#allocation5 + $0x218] sm:$0xff]  ;;  %s1268_s9 = smov [#allocation10]  }
  0x4c   :  { %v158_v2 = vld [vmem:[#allocation5 + $0x200] sm:$0xff]  ;;  %v925_v3 = vpack.c.bf16 %v161_v1, %v159_v0  ;;  %v160_v4 = vld [vmem:[#allocation5 + $0x210] sm:$0xff]  ;;  %v163_v5 = vld [vmem:[#allocation5 + $0x228] sm:$0xff]  ;;  %s754_s10 = sshll.u32 %s1268_s9, 4  ;;  %s755_s10 = int_to_ptr.vmem [resolvable:$true] %s754_s10 }
  0x4d   :  { %v165_v6 = vld [vmem:[#allocation5 + $0x238] sm:$0xff]  ;;  %v927_v7 = vpack.c.bf16 %v160_v4, %v158_v2  ;;  %v162_v9 = vld [vmem:[#allocation5 + $0x220] sm:$0xff]  ;;  %v164_v10 = vld [vmem:[#allocation5 + $0x230] sm:$0xff]  ;;  %p1233_p5 = scmp.lt.s32.totalorder %s755_s10, %s755_s10 }
  0x4e   :  { %v929_v8 = vpack.c.bf16 %v165_v6, %v163_v5  ;;  %v167_v11 = vld [vmem:[#allocation5 + $0x248] sm:$0xff]  ;;  %926 = vmatprep.subr.bf16.mxu0 %v925_v3  ;;  %v169_v12 = vld [vmem:[#allocation5 + $0x258] sm:$0xff]  ;;  %v931_v13 = vpack.c.bf16 %v164_v10, %v162_v9  ;;  %v166_v15 = vld [vmem:[#allocation5 + $0x240] sm:$0xff] }
  0x4f   :  { %928 = vmatpush1.bf16.msra.mxu0 %v927_v7  ;;  %v933_v14 = vpack.c.bf16 %v169_v12, %v167_v11  ;;  %v168_v16 = vld [vmem:[#allocation5 + $0x250] sm:$0xff]  ;;  %v171_v17 = vld [vmem:[#allocation5 + $0x268] sm:$0xff]  ;;  %v173_v18 = vld [vmem:[#allocation5 + $0x278] sm:$0xff] }
  0x50   :  { %930 = vmatprep.subr.bf16.mxu0 %v929_v8  ;;  %v935_v19 = vpack.c.bf16 %v168_v16, %v166_v15  ;;  %v937_v20 = vpack.c.bf16 %v173_v18, %v171_v17  ;;  %v170_v21 = vld [vmem:[#allocation5 + $0x260] sm:$0xff]  ;;  %v172_v22 = vld [vmem:[#allocation5 + $0x270] sm:$0xff]  ;;  %v175_v23 = vld [vmem:[#allocation5 + $0x288] sm:$0xff] }
  0x51   :  { %v177_v24 = vld [vmem:[#allocation5 + $0x298] sm:$0xff]  ;;  %v939_v25 = vpack.c.bf16 %v172_v22, %v170_v21  ;;  %v174_v27 = vld [vmem:[#allocation5 + $0x280] sm:$0xff]  ;;  %v176_v28 = vld [vmem:[#allocation5 + $0x290] sm:$0xff] }
  0x52   :  { %v941_v26 = vpack.c.bf16 %v177_v24, %v175_v23  ;;  %v179_v29 = vld [vmem:[#allocation5 + $0x2a8] sm:$0xff]  ;;  %v181_v30 = vld [vmem:[#allocation5 + $0x2b8] sm:$0xff]  ;;  %v943_v31 = vpack.c.bf16 %v176_v28, %v174_v27  ;;  %v178_v33 = vld [vmem:[#allocation5 + $0x2a0] sm:$0xff] }
  0x53   :  { %932 = vmatpush1.bf16.msra.mxu0 %v931_v13  ;;  %v945_v32 = vpack.c.bf16 %v181_v30, %v179_v29  ;;  %v180_v34 = vld [vmem:[#allocation5 + $0x2b0] sm:$0xff]  ;;  %v183_v35 = vld [vmem:[#allocation5 + $0x2c8] sm:$0xff]  ;;  %v185_v36 = vld [vmem:[#allocation5 + $0x2d8] sm:$0xff] }
  0x54   :  { %934 = vmatprep.subr.bf16.mxu0 %v933_v14  ;;  %v947_v37 = vpack.c.bf16 %v180_v34, %v178_v33  ;;  %v182_v38 = vld [vmem:[#allocation5 + $0x2c0] sm:$0xff]  ;;  %v184_v39 = vld [vmem:[#allocation5 + $0x2d0] sm:$0xff]  ;;  %v95_v40 = vld [vmem:[#allocation5 + $0x8] sm:$0xff]  ;;  %v949_v41 = vpack.c.bf16 %v185_v36, %v183_v35 }
  0x55   :  { %v187_v42 = vld [vmem:[#allocation5 + $0x2e8] sm:$0xff]  ;;  %v189_v43 = vld [vmem:[#allocation5 + $0x2f8] sm:$0xff]  ;;  %v94_v46 = vld [vmem:[#allocation5] sm:$0xff]  ;;  %v951_v51 = vpack.c.bf16 %v184_v39, %v182_v38 }
  0x56   :  { %v97_v44 = vld [vmem:[#allocation5 + $0x18] sm:$0xff]  ;;  %v96_v47 = vld [vmem:[#allocation5 + $0x10] sm:$0xff]  ;;  %v99_v50 = vld [vmem:[#allocation5 + $0x28] sm:$0xff]  ;;  %v953_v54 = vpack.c.bf16 %v189_v43, %v187_v42 }
  0x57   :  { %936 = vmatpush1.bf16.msra.mxu0 %v935_v19  ;;  %v861_v45 = vpack.c.bf16 %v97_v44, %v95_v40  ;;  %v85_v48 = vld [vmem:[#allocation2 + $0x18] sm:$0xff]  ;;  %v863_v49 = vpack.c.bf16 %v96_v47, %v94_v46  ;;  %v186_v52 = vld [vmem:[#allocation5 + $0x2e0] sm:$0xff]  ;;  %v188_v55 = vld [vmem:[#allocation5 + $0x2f0] sm:$0xff] }
  0x58   :  { %938 = vmatprep.subr.bf16.mxu0 %v937_v20  ;;  %439 = vmatprep.mubr.f32.mxu0 %v85_v48  ;;  %v101_v53 = vld [vmem:[#allocation5 + $0x38] sm:$0xff]  ;;  %v98_v57 = vld [vmem:[#allocation5 + $0x20] sm:$0xff]  ;;  %v100_v58 = vld [vmem:[#allocation5 + $0x30] sm:$0xff]  ;;  %v955_v0 = vpack.c.bf16 %v188_v55, %v186_v52 }
  0x59   :  { %862 = vmatprep.subr.bf16.mxu1 %v861_v45  ;;  %v865_v56 = vpack.c.bf16 %v101_v53, %v99_v50  ;;  %v191_v59 = vld [vmem:[#allocation5 + $0x308] sm:$0xff]  ;;  %v193_v60 = vld [vmem:[#allocation5 + $0x318] sm:$0xff]  ;;  %v867_v61 = vpack.c.bf16 %v100_v58, %v98_v57  ;;  %v190_v1 = vld [vmem:[#allocation5 + $0x300] sm:$0xff] }
  0x5a   :  { %864 = vmatpush1.bf16.msra.mxu1 %v863_v49  ;;  %v103_v62 = vld [vmem:[#allocation5 + $0x48] sm:$0xff]  ;;  %v105_v63 = vld [vmem:[#allocation5 + $0x58] sm:$0xff]  ;;  %v102_v3 = vld [vmem:[#allocation5 + $0x40] sm:$0xff]  ;;  %v957_v5 = vpack.c.bf16 %v193_v60, %v191_v59 }
  0x5b   :  { %940 = vmatpush1.bf16.msra.mxu0 %v939_v25  ;;  %866 = vmatprep.subr.bf16.mxu1 %v865_v56  ;;  %v869_v2 = vpack.c.bf16 %v105_v63, %v103_v62  ;;  %v104_v4 = vld [vmem:[#allocation5 + $0x50] sm:$0xff]  ;;  %v107_v8 = vld [vmem:[#allocation5 + $0x68] sm:$0xff]  ;;  %v109_v9 = vld [vmem:[#allocation5 + $0x78] sm:$0xff] }
  0x5c   :  { %942 = vmatprep.subr.bf16.mxu0 %v941_v26  ;;  %v192_v6 = vld [vmem:[#allocation5 + $0x310] sm:$0xff]  ;;  %v871_v7 = vpack.c.bf16 %v104_v4, %v102_v3  ;;  %v195_v10 = vld [vmem:[#allocation5 + $0x328] sm:$0xff]  ;;  %v197_v11 = vld [vmem:[#allocation5 + $0x338] sm:$0xff]  ;;  %v873_v12 = vpack.c.bf16 %v109_v9, %v107_v8 }
  0x5d   :  { %v106_v13 = vld [vmem:[#allocation5 + $0x60] sm:$0xff]  ;;  %v108_v14 = vld [vmem:[#allocation5 + $0x70] sm:$0xff]  ;;  %v959_v15 = vpack.c.bf16 %v192_v6, %v190_v1  ;;  %v111_v16 = vld [vmem:[#allocation5 + $0x88] sm:$0xff]  ;;  %v961_v18 = vpack.c.bf16 %v197_v11, %v195_v10 }
  0x5e   :  { %868 = vmatpush1.bf16.msra.mxu1 %v867_v61  ;;  %v113_v17 = vld [vmem:[#allocation5 + $0x98] sm:$0xff]  ;;  %v194_v19 = vld [vmem:[#allocation5 + $0x320] sm:$0xff]  ;;  %v196_v20 = vld [vmem:[#allocation5 + $0x330] sm:$0xff]  ;;  %v875_v22 = vpack.c.bf16 %v108_v14, %v106_v13 }
  0x5f   :  { %944 = vmatpush1.bf16.msra.mxu0 %v943_v31  ;;  %870 = vmatprep.subr.bf16.mxu1 %v869_v2  ;;  %v199_v21 = vld [vmem:[#allocation5 + $0x348] sm:$0xff]  ;;  %v201_v23 = vld [vmem:[#allocation5 + $0x358] sm:$0xff]  ;;  %v877_v24 = vpack.c.bf16 %v113_v17, %v111_v16  ;;  %v110_v25 = vld [vmem:[#allocation5 + $0x80] sm:$0xff]  ;;  %v963_v29 = vpack.c.bf16 %v196_v20, %v194_v19 }
  0x60   :  { %946 = vmatprep.subr.bf16.mxu0 %v945_v32  ;;  %v112_v26 = vld [vmem:[#allocation5 + $0x90] sm:$0xff]  ;;  %v115_v27 = vld [vmem:[#allocation5 + $0xa8] sm:$0xff]  ;;  %v117_v28 = vld [vmem:[#allocation5 + $0xb8] sm:$0xff]  ;;  %v965_v30 = vpack.c.bf16 %v201_v23, %v199_v21 }
  0x61   :  { %v198_v31 = vld [vmem:[#allocation5 + $0x340] sm:$0xff]  ;;  %v200_v32 = vld [vmem:[#allocation5 + $0x350] sm:$0xff]  ;;  %v203_v33 = vld [vmem:[#allocation5 + $0x368] sm:$0xff]  ;;  %v879_v34 = vpack.c.bf16 %v112_v26, %v110_v25  ;;  %v881_v36 = vpack.c.bf16 %v117_v28, %v115_v27 }
  0x62   :  { %872 = vmatpush1.bf16.msra.mxu1 %v871_v7  ;;  %v205_v35 = vld [vmem:[#allocation5 + $0x378] sm:$0xff]  ;;  %v116_v38 = vld [vmem:[#allocation5 + $0xb0] sm:$0xff]  ;;  %v119_v39 = vld [vmem:[#allocation5 + $0xc8] sm:$0xff] }
  0x63   :  { %948 = vmatpush1.bf16.msra.mxu0 %v947_v37  ;;  %874 = vmatprep.subr.bf16.mxu1 %v873_v12  ;;  %v114_v37 = vld [vmem:[#allocation5 + $0xa0] sm:$0xff]  ;;  %v121_v40 = vld [vmem:[#allocation5 + $0xd8] sm:$0xff]  ;;  %v969_v42 = vpack.c.bf16 %v205_v35, %v203_v33  ;;  %v204_v44 = vld [vmem:[#allocation5 + $0x370] sm:$0xff] }
  0x64   :  { %950 = vmatprep.subr.bf16.mxu0 %v949_v41  ;;  %v967_v41 = vpack.c.bf16 %v200_v32, %v198_v31  ;;  %v202_v43 = vld [vmem:[#allocation5 + $0x360] sm:$0xff]  ;;  %v207_v45 = vld [vmem:[#allocation5 + $0x388] sm:$0xff]  ;;  %v883_v46 = vpack.c.bf16 %v116_v38, %v114_v37  ;;  %v209_v47 = vld [vmem:[#allocation5 + $0x398] sm:$0xff]  ;;  %v885_v48 = vpack.c.bf16 %v121_v40, %v119_v39 }
  0x65   :  { %v118_v49 = vld [vmem:[#allocation5 + $0xc0] sm:$0xff]  ;;  %v120_v50 = vld [vmem:[#allocation5 + $0xd0] sm:$0xff]  ;;  %v125_v52 = vld [vmem:[#allocation5 + $0xf8] sm:$0xff]  ;;  %v971_v53 = vpack.c.bf16 %v204_v44, %v202_v43 }
  0x66   :  { %876 = vmatpush1.bf16.msra.mxu1 %v875_v22  ;;  %v206_v55 = vld [vmem:[#allocation5 + $0x380] sm:$0xff]  ;;  %v208_v56 = vld [vmem:[#allocation5 + $0x390] sm:$0xff]  ;;  %v211_v57 = vld [vmem:[#allocation5 + $0x3a8] sm:$0xff]  ;;  %v887_v58 = vpack.c.bf16 %v120_v50, %v118_v49 }
  0x67   :  { %952 = vmatpush1.bf16.msra.mxu0 %v951_v51  ;;  %878 = vmatprep.subr.bf16.mxu1 %v877_v24  ;;  %v123_v51 = vld [vmem:[#allocation5 + $0xe8] sm:$0xff]  ;;  %v213_v59 = vld [vmem:[#allocation5 + $0x3b8] sm:$0xff]  ;;  %v122_v61 = vld [vmem:[#allocation5 + $0xe0] sm:$0xff]  ;;  %v975_v1 = vpack.c.bf16 %v208_v56, %v206_v55 }
  0x68   :  { %954 = vmatprep.subr.bf16.mxu0 %v953_v54  ;;  %v973_v54 = vpack.c.bf16 %v209_v47, %v207_v45  ;;  %v889_v60 = vpack.c.bf16 %v125_v52, %v123_v51  ;;  %v124_v62 = vld [vmem:[#allocation5 + $0xf0] sm:$0xff]  ;;  %v127_v63 = vld [vmem:[#allocation5 + $0x108] sm:$0xff]  ;;  %v977_v2 = vpack.c.bf16 %v213_v59, %v211_v57  ;;  %v210_v3 = vld [vmem:[#allocation5 + $0x3a0] sm:$0xff] }
  0x69   :  { %v212_v4 = vld [vmem:[#allocation5 + $0x3b0] sm:$0xff]  ;;  %v891_v6 = vpack.c.bf16 %v124_v62, %v122_v61  ;;  %v217_v7 = vld [vmem:[#allocation5 + $0x3d8] sm:$0xff]  ;;  %v126_v9 = vld [vmem:[#allocation5 + $0x100] sm:$0xff] }
  0x6a   :  { %880 = vmatpush1.bf16.msra.mxu1 %v879_v34  ;;  %v128_v10 = vld [vmem:[#allocation5 + $0x110] sm:$0xff]  ;;  %v131_v11 = vld [vmem:[#allocation5 + $0x128] sm:$0xff]  ;;  %v133_v12 = vld [vmem:[#allocation5 + $0x138] sm:$0xff]  ;;  %v979_v13 = vpack.c.bf16 %v212_v4, %v210_v3 }
  0x6b   :  { %956 = vmatpush1.bf16.msra.mxu0 %v955_v0  ;;  %882 = vmatprep.subr.bf16.mxu1 %v881_v36  ;;  %v129_v0 = vld [vmem:[#allocation5 + $0x118] sm:$0xff]  ;;  %v216_v16 = vld [vmem:[#allocation5 + $0x3d0] sm:$0xff]  ;;  %v219_v17 = vld [vmem:[#allocation5 + $0x3e8] sm:$0xff]  ;;  %v897_v20 = vpack.c.bf16 %v133_v12, %v131_v11 }
  0x6c   :  { %958 = vmatprep.subr.bf16.mxu0 %v957_v5  ;;  %v215_v5 = vld [vmem:[#allocation5 + $0x3c8] sm:$0xff]  ;;  %v893_v8 = vpack.c.bf16 %v129_v0, %v127_v63  ;;  %v221_v19 = vld [vmem:[#allocation5 + $0x3f8] sm:$0xff]  ;;  %v130_v21 = vld [vmem:[#allocation5 + $0x120] sm:$0xff] }
  0x6d   :  { %v981_v14 = vpack.c.bf16 %v217_v7, %v215_v5  ;;  %v132_v22 = vld [vmem:[#allocation5 + $0x130] sm:$0xff]  ;;  %v135_v23 = vld [vmem:[#allocation5 + $0x148] sm:$0xff]  ;;  %v137_v24 = vld [vmem:[#allocation5 + $0x158] sm:$0xff]  ;;  %v985_v26 = vpack.c.bf16 %v221_v19, %v219_v17 }
  0x6e   :  { %884 = vmatpush1.bf16.msra.mxu1 %v883_v46  ;;  %v218_v27 = vld [vmem:[#allocation5 + $0x3e0] sm:$0xff]  ;;  %v220_v28 = vld [vmem:[#allocation5 + $0x3f0] sm:$0xff]  ;;  %v225_v31 = vld [vmem:[#allocation5 + $0x418] sm:$0xff]  ;;  %v901_v32 = vpack.c.bf16 %v137_v24, %v135_v23 }
  0x6f   :  { %960 = vmatpush1.bf16.msra.mxu0 %v959_v15  ;;  %886 = vmatprep.subr.bf16.mxu1 %v885_v48  ;;  %v214_v15 = vld [vmem:[#allocation5 + $0x3c0] sm:$0xff]  ;;  %v136_v34 = vld [vmem:[#allocation5 + $0x150] sm:$0xff]  ;;  %v139_v35 = vld [vmem:[#allocation5 + $0x168] sm:$0xff]  ;;  %v987_v37 = vpack.c.bf16 %v220_v28, %v218_v27 }
  0x70   :  { %962 = vmatprep.subr.bf16.mxu0 %v961_v18  ;;  %v895_v18 = vpack.c.bf16 %v128_v10, %v126_v9  ;;  %v983_v25 = vpack.c.bf16 %v216_v16, %v214_v15  ;;  %v134_v33 = vld [vmem:[#allocation5 + $0x140] sm:$0xff]  ;;  %v141_v36 = vld [vmem:[#allocation5 + $0x178] sm:$0xff]  ;;  %v224_v40 = vld [vmem:[#allocation5 + $0x410] sm:$0xff] }
  0x71   :  { %v222_v39 = vld [vmem:[#allocation5 + $0x400] sm:$0xff]  ;;  %v229_v43 = vld [vmem:[#allocation5 + $0x438] sm:$0xff]  ;;  %v905_v44 = vpack.c.bf16 %v141_v36, %v139_v35  ;;  %v140_v46 = vld [vmem:[#allocation5 + $0x170] sm:$0xff] }
  0x72   :  { %888 = vmatpush1.bf16.msra.mxu1 %v887_v58  ;;  %v138_v45 = vld [vmem:[#allocation5 + $0x160] sm:$0xff]  ;;  %v143_v47 = vld [vmem:[#allocation5 + $0x188] sm:$0xff]  ;;  %v145_v48 = vld [vmem:[#allocation5 + $0x198] sm:$0xff]  ;;  %v991_v51 = vpack.c.bf16 %v224_v40, %v222_v39 }
  0x73   :  { %964 = vmatpush1.bf16.msra.mxu0 %v963_v29  ;;  %890 = vmatprep.subr.bf16.mxu1 %v889_v60  ;;  %v223_v29 = vld [vmem:[#allocation5 + $0x408] sm:$0xff]  ;;  %v84_v50 = vld [vmem:[#allocation2 + $0x10] sm:$0xff]  ;;  %v226_v52 = vld [vmem:[#allocation5 + $0x420] sm:$0xff]  ;;  %v907_v56 = vpack.c.bf16 %v140_v46, %v138_v45  ;;  %v909_v59 = vpack.c.bf16 %v145_v48, %v143_v47 }
  0x74   :  { %966 = vmatprep.subr.bf16.mxu0 %v965_v30  ;;  %v899_v30 = vpack.c.bf16 %v132_v22, %v130_v21  ;;  %v989_v38 = vpack.c.bf16 %v225_v31, %v223_v29  ;;  %v83_v49 = vld [vmem:[#allocation2 + $0x8] sm:$0xff]  ;;  %v233_v58 = vld [vmem:[#allocation5 + $0x458] sm:$0xff]  ;;  %v142_v60 = vld [vmem:[#allocation5 + $0x180] sm:$0xff] }
  0x75   :  { %362 = vmatprep.mubr.f32.mxu1 %v83_v49  ;;  %v231_v55 = vld [vmem:[#allocation5 + $0x448] sm:$0xff]  ;;  %v144_v61 = vld [vmem:[#allocation5 + $0x190] sm:$0xff]  ;;  %v149_v63 = vld [vmem:[#allocation5 + $0x1b8] sm:$0xff] }
  0x76   :  { %892 = vmatpush1.bf16.msra.mxu1 %v891_v6  ;;  %v91_v57 = vld [vmem:[#allocation2 + $0x48] sm:$0xff]  ;;  %v997_v3 = vpack.c.bf16 %v233_v58, %v231_v55  ;;  %v232_v4 = vld [vmem:[#allocation5 + $0x450] sm:$0xff]  ;;  %v911_v6 = vpack.c.bf16 %v144_v61, %v142_v60  ;;  %v146_v10 = vld [vmem:[#allocation5 + $0x1a0] sm:$0xff] }
  0x77   :  { %968 = vmatpush1.bf16.msra.mxu0 %v967_v41  ;;  %894 = vmatprep.subr.bf16.mxu1 %v893_v8  ;;  %v227_v41 = vld [vmem:[#allocation5 + $0x428] sm:$0xff]  ;;  %v237_v8 = vld [vmem:[#allocation5 + $0x478] sm:$0xff]  ;;  %v148_v11 = vld [vmem:[#allocation5 + $0x1b0] sm:$0xff] }
  0x78   :  { %970 = vmatprep.subr.bf16.mxu0 %v969_v42  ;;  %v903_v42 = vpack.c.bf16 %v136_v34, %v134_v33  ;;  %v147_v62 = vld [vmem:[#allocation5 + $0x1a8] sm:$0xff]  ;;  %v234_v16 = vld [vmem:[#allocation5 + $0x460] sm:$0xff]  ;;  %v236_v17 = vld [vmem:[#allocation5 + $0x470] sm:$0xff]  ;;  %v915_v19 = vpack.c.bf16 %v148_v11, %v146_v10 }
  0x79   :  { %v235_v5 = vld [vmem:[#allocation5 + $0x468] sm:$0xff]  ;;  %v913_v9 = vpack.c.bf16 %v149_v63, %v147_v62  ;;  %v150_v22 = vld [vmem:[#allocation5 + $0x1c0] sm:$0xff]  ;;  %v152_v23 = vld [vmem:[#allocation5 + $0x1d0] sm:$0xff] }
  0x7a   :  { %896 = vmatpush1.bf16.msra.mxu1 %v895_v18  ;;  %v87_v7 = vld [vmem:[#allocation2 + $0x28] sm:$0xff]  ;;  %v1001_v15 = vpack.c.bf16 %v237_v8, %v235_v5  ;;  %v238_v28 = vld [vmem:[#allocation5 + $0x480] sm:$0xff]  ;;  %v240_v29 = vld [vmem:[#allocation5 + $0x490] sm:$0xff]  ;;  %v919_v31 = vpack.c.bf16 %v152_v23, %v150_v22 }
  0x7b   :  { %972 = vmatpush1.bf16.msra.mxu0 %v971_v53  ;;  %898 = vmatprep.subr.bf16.mxu1 %v897_v20  ;;  %v993_v53 = vpack.c.bf16 %v229_v43, %v227_v41  ;;  %v151_v12 = vld [vmem:[#allocation5 + $0x1c8] sm:$0xff]  ;;  %v241_v20 = vld [vmem:[#allocation5 + $0x498] sm:$0xff]  ;;  %v154_v34 = vld [vmem:[#allocation5 + $0x1e0] sm:$0xff] }
  0x7c   :  { %974 = vmatprep.subr.bf16.mxu0 %v973_v54  ;;  %v228_v54 = vld [vmem:[#allocation5 + $0x430] sm:$0xff]  ;;  %v239_v18 = vld [vmem:[#allocation5 + $0x488] sm:$0xff]  ;;  %v549_v36 = vld [vmem:[#allocation7 + $0x80] sm:$0xff] }
  0x7d   :  { %v995_v0 = vpack.c.bf16 %v228_v54, %v226_v52  ;;  %v155_v24 = vld [vmem:[#allocation5 + $0x1e8] sm:$0xff]  ;;  %v1005_v27 = vpack.c.bf16 %v241_v20, %v239_v18  ;;  %v156_v35 = vld [vmem:[#allocation5 + $0x1f0] sm:$0xff]  ;;  %v242_v40 = vld [vmem:[#allocation5 + $0x4a0] sm:$0xff] }
  0x7e   :  { %900 = vmatpush1.bf16.msra.mxu1 %v899_v30  ;;  %v243_v30 = vld [vmem:[#allocation5 + $0x4a8] sm:$0xff]  ;;  %v244_v41 = vld [vmem:[#allocation5 + $0x4b0] sm:$0xff]  ;;  %v533_v46 = vld [vmem:[#allocation7] sm:$0xff] }
  0x7f   :  { %976 = vmatpush1.bf16.msra.mxu0 %v975_v1  ;;  %902 = vmatprep.subr.bf16.mxu1 %v901_v32  ;;  %v230_v1 = vld [vmem:[#allocation5 + $0x440] sm:$0xff]  ;;  %v245_v32 = vld [vmem:[#allocation5 + $0x4b8] sm:$0xff]  ;;  %v247_v43 = vld [vmem:[#allocation5 + $0x4c8] sm:$0xff]  ;;  %v1011_v48 = vpack.c.bf16 %v244_v41, %v242_v40 }
  0x80   :  { %978 = vmatprep.subr.bf16.mxu0 %v977_v2  ;;  %v90_v2 = vld [vmem:[#allocation2 + $0x40] sm:$0xff]  ;;  %v1009_v39 = vpack.c.bf16 %v245_v32, %v243_v30  ;;  %v534_v47 = vld [vmem:[#allocation7 + $0x8] sm:$0xff]  ;;  %v551_v49 = vld [vmem:[#allocation7 + $0x90] sm:$0xff] }
  0x81   :  { %v246_v52 = vld [vmem:[#allocation5 + $0x4c0] sm:$0xff]  ;;  %v251_v55 = vld [vmem:[#allocation5 + $0x4e8] sm:$0xff]  ;;  %v1055_v58 = vpack.c.bf16 %v534_v47, %v533_v46  ;;  %v535_v60 = vld [vmem:[#allocation7 + $0x10] sm:$0xff] }
  0x82   :  { %904 = vmatpush1.bf16.msra.mxu1 %v903_v42  ;;  %v923_v42 = vpack.c.bf16 %v156_v35, %v154_v34  ;;  %v82_v54 = vld [vmem:[#allocation2] sm:$0xff]  ;;  %v536_v61 = vld [vmem:[#allocation7 + $0x18] sm:$0xff]  ;;  %v255_v5 = vld [vmem:[#allocation5 + $0x508] sm:$0xff] }
  0x83   :  { %980 = vmatpush1.bf16.msra.mxu0 %v979_v13  ;;  %906 = vmatprep.subr.bf16.mxu1 %v905_v44  ;;  %v153_v13 = vld [vmem:[#allocation5 + $0x1d8] sm:$0xff]  ;;  %v553_v63 = vld [vmem:[#allocation7 + $0xa0] sm:$0xff]  ;;  %v538_v10 = vld [vmem:[#allocation7 + $0x28] sm:$0xff] }
  0x84   :  { %982 = vmatprep.subr.bf16.mxu0 %v981_v14  ;;  %v999_v14 = vpack.c.bf16 %v232_v4, %v230_v1  ;;  %v917_v21 = vpack.c.bf16 %v153_v13, %v151_v12  ;;  %v249_v44 = vld [vmem:[#allocation5 + $0x4d8] sm:$0xff]  ;;  %v88_v4 = vld [vmem:[#allocation2 + $0x30] sm:$0xff]  ;;  %v542_v34 = vld [vmem:[#allocation7 + $0x48] sm:$0xff] }
  0x85   :  { %v555_v12 = vld [vmem:[#allocation7 + $0xb0] sm:$0xff]  ;;  %v556_v13 = vld [vmem:[#allocation7 + $0xb8] sm:$0xff]  ;;  %v267_v41 = vld [vmem:[#allocation5 + $0x568] sm:$0xff] }
  0x86   :  { %908 = vmatpush1.bf16.msra.mxu1 %v907_v56  ;;  %v253_v56 = vld [vmem:[#allocation5 + $0x4f8] sm:$0xff]  ;;  %v1065_v20 = vpack.c.bf16 %v556_v13, %v555_v12  ;;  %v264_v40 = vld [vmem:[#allocation5 + $0x550] sm:$0xff]  ;;  %v86_v13 = vld [vmem:[#allocation2 + $0x20] sm:$0xff] }
  0x87   :  { %984 = vmatpush1.bf16.msra.mxu0 %v983_v25  ;;  %910 = vmatprep.subr.bf16.mxu1 %v909_v59  ;;  %v157_v25 = vld [vmem:[#allocation5 + $0x1f8] sm:$0xff]  ;;  %v1017_v1 = vpack.c.bf16 %v253_v56, %v251_v55  ;;  %v270_v56 = vld [vmem:[#allocation5 + $0x580] sm:$0xff] }
  0x88   :  { %986 = vmatprep.subr.bf16.mxu0 %v985_v26  ;;  %v1003_v26 = vpack.c.bf16 %v236_v17, %v234_v16  ;;  %v921_v33 = vpack.c.bf16 %v157_v25, %v155_v24  ;;  %v256_v16 = vld [vmem:[#allocation5 + $0x510] sm:$0xff]  ;;  %v259_v17 = vld [vmem:[#allocation5 + $0x528] sm:$0xff]  ;;  %v261_v18 = vld [vmem:[#allocation5 + $0x538] sm:$0xff] }
  0x89   :  { %v540_v22 = vld [vmem:[#allocation7 + $0x38] sm:$0xff]  ;;  %v557_v24 = vld [vmem:[#allocation7 + $0xc0] sm:$0xff]  ;;  %v558_v25 = vld [vmem:[#allocation7 + $0xc8] sm:$0xff] }
  0x8a   :  { %912 = vmatpush1.bf16.msra.mxu1 %v911_v6  ;;  %v257_v6 = vld [vmem:[#allocation5 + $0x518] sm:$0xff]  ;;  %v1069_v32 = vpack.c.bf16 %v558_v25, %v557_v24  ;;  %v547_v25 = vld [vmem:[#allocation7 + $0x70] sm:$0xff] }
  0x8b   :  { %988 = vmatpush1.bf16.msra.mxu0 %v987_v37  ;;  %914 = vmatprep.subr.bf16.mxu1 %v913_v9  ;;  %v550_v37 = vld [vmem:[#allocation7 + $0x88] sm:$0xff]  ;;  %v537_v9 = vld [vmem:[#allocation7 + $0x20] sm:$0xff]  ;;  %v265_v30 = vld [vmem:[#allocation5 + $0x558] sm:$0xff] }
  0x8c   :  { %990 = vmatprep.subr.bf16.mxu0 %v989_v38  ;;  %v1007_v38 = vpack.c.bf16 %v240_v29, %v238_v28  ;;  %v1053_v45 = vpack.c.bf16 %v550_v37, %v549_v36  ;;  %v260_v28 = vld [vmem:[#allocation5 + $0x530] sm:$0xff]  ;;  %v263_v29 = vld [vmem:[#allocation5 + $0x548] sm:$0xff]  ;;  %v560_v37 = vld [vmem:[#allocation7 + $0xd8] sm:$0xff] }
  0x8d   :  { %v559_v36 = vld [vmem:[#allocation7 + $0xd0] sm:$0xff]  ;;  %v544_v46 = vld [vmem:[#allocation7 + $0x58] sm:$0xff] }
  0x8e   :  { %440 = vmatmul.mubr.f32.vlgmr.msra.gmra.mrb[0].mxu0 %v84_v50  ;;  %916 = vmatpush1.bf16.msra.mxu1 %v915_v19  ;;  %v552_v50 = vld [vmem:[#allocation7 + $0x98] sm:$0xff]  ;;  %v1063_v19 = vpack.c.bf16 %v538_v10, %v537_v9  ;;  %v282_v10 = vld [vmem:[#allocation5 + $0x5e0] sm:$0xff] }
  0x8f   :  { %992 = vmatpush1.bf16.msra.mxu0 %v991_v51  ;;  %445 = vmatprep.mubr.f32.mxu0 %v91_v57  ;;  %v1013_v51 = vpack.c.bf16 %v249_v44, %v247_v43  ;;  %v89_v57 = vld [vmem:[#allocation2 + $0x38] sm:$0xff]  ;;  %v1057_v59 = vpack.c.bf16 %v552_v50, %v551_v49  ;;  %v1073_v44 = vpack.c.bf16 %v560_v37, %v559_v36  ;;  %v266_v49 = vld [vmem:[#allocation5 + $0x560] sm:$0xff]  ;;  %v268_v50 = vld [vmem:[#allocation5 + $0x570] sm:$0xff] }
  0x90   :  { %994 = vmatprep.subr.bf16.mxu0 %v993_v53  ;;  %918 = vmatprep.subr.bf16.mxu1 %v917_v21  ;;  %v248_v53 = vld [vmem:[#allocation5 + $0x4d0] sm:$0xff] }
  0x91   :  { %v1015_v62 = vpack.c.bf16 %v248_v53, %v246_v52  ;;  %v539_v21 = vld [vmem:[#allocation7 + $0x30] sm:$0xff]  ;;  %v273_v52 = vld [vmem:[#allocation5 + $0x598] sm:$0xff] }
  0x92   :  { %446 = vmatmul.mubr.f32.gmra.mrb[2].mxu0 %v90_v2  ;;  %920 = vmatpush1.bf16.msra.mxu1 %v919_v31  ;;  %v250_v2 = vld [vmem:[#allocation5 + $0x4e0] sm:$0xff]  ;;  %v1067_v31 = vpack.c.bf16 %v540_v22, %v539_v21  ;;  %v563_v22 = vld [vmem:[#allocation7 + $0xf0] sm:$0xff] }
  0x93   :  { %996 = vmatpush1.bf16.msra.mxu0 %v995_v0  ;;  %516 = vmatprep.mubr.f32.mxu0 %v87_v7  ;;  %v554_v0 = vld [vmem:[#allocation7 + $0xa8] sm:$0xff]  ;;  %v1059_v7 = vpack.c.bf16 %v536_v61, %v535_v60 }
  0x94   :  { %998 = vmatprep.subr.bf16.mxu0 %v997_v3  ;;  %922 = vmatprep.subr.bf16.mxu1 %v921_v33  ;;  %v252_v3 = vld [vmem:[#allocation5 + $0x4f0] sm:$0xff]  ;;  %v1061_v8 = vpack.c.bf16 %v554_v0, %v553_v63  ;;  %v541_v33 = vld [vmem:[#allocation7 + $0x40] sm:$0xff]  ;;  %v279_v0 = vld [vmem:[#allocation5 + $0x5c8] sm:$0xff] }
  0x95   :  { %v1019_v11 = vpack.c.bf16 %v252_v3, %v250_v2  ;;  %v1071_v43 = vpack.c.bf16 %v542_v34, %v541_v33  ;;  %v276_v63 = vld [vmem:[#allocation5 + $0x5b0] sm:$0xff] }
  0x96   :  { %924 = vmatpush1.bf16.msra.mxu1 %v923_v42  ;;  %v269_v42 = vld [vmem:[#allocation5 + $0x578] sm:$0xff] }
  0x97   :  { %1000 = vmatpush1.bf16.msra.mxu0 %v999_v14  ;;  %1054 = vmatprep.subr.bf16.mxu1 %v1053_v45  ;;  %v1021_v14 = vpack.c.bf16 %v257_v6, %v255_v5  ;;  %v543_v45 = vld [vmem:[#allocation7 + $0x50] sm:$0xff]  ;;  %v283_v6 = vld [vmem:[#allocation5 + $0x5e8] sm:$0xff] }
  0x98   :  { %1002 = vmatprep.subr.bf16.mxu0 %v1001_v15  ;;  %v254_v15 = vld [vmem:[#allocation5 + $0x500] sm:$0xff]  ;;  %v1075_v53 = vpack.c.bf16 %v544_v46, %v543_v45  ;;  %v280_v5 = vld [vmem:[#allocation5 + $0x5d0] sm:$0xff] }
  0x99   :  { %363 = vmatmul.mubr.f32.vlgmr.msra.gmra.mrb[0].mxu1 %v82_v54  ;;  %v1023_v23 = vpack.c.bf16 %v256_v16, %v254_v15  ;;  %v1035_v54 = vpack.c.bf16 %v268_v50, %v266_v49  ;;  %v92_v15 = vld [vmem:[#allocation2 + $0x50] sm:$0xff]  ;;  %v561_v16 = vld [vmem:[#allocation7 + $0xe0] sm:$0xff] }
  0x9a   :  { %368 = vmatprep.mubr.f32.mxu1 %v89_v57  ;;  %1056 = vmatpush3.bf16.msra.mxu1 %v1055_v58  ;;  %v272_v57 = vld [vmem:[#allocation5 + $0x590] sm:$0xff]  ;;  %v275_v58 = vld [vmem:[#allocation5 + $0x5a8] sm:$0xff] }
  0x9b   :  { %1004 = vmatpush1.bf16.msra.mxu0 %v1003_v26  ;;  %1058 = vmatprep.subr.bf16.mxu1 %v1057_v59  ;;  %v1025_v26 = vpack.c.bf16 %v261_v18, %v259_v17  ;;  %v277_v59 = vld [vmem:[#allocation5 + $0x5b8] sm:$0xff]  ;;  %v1039_v60 = vpack.c.bf16 %v272_v57, %v270_v56  ;;  %v562_v17 = vld [vmem:[#allocation7 + $0xe8] sm:$0xff]  ;;  %v651_v50 = vld [vmem:[#allocation8 + $0x10] sm:$0xff] }
  0x9c   :  { %1006 = vmatprep.subr.bf16.mxu0 %v1005_v27  ;;  %v258_v27 = vld [vmem:[#allocation5 + $0x520] sm:$0xff]  ;;  %v1041_v61 = vpack.c.bf16 %v277_v59, %v275_v58  ;;  %v1077_v18 = vpack.c.bf16 %v562_v17, %v561_v16 }
  0x9d   :  { %369 = vmatmul.mubr.f32.gmra.mrb[2].mxu1 %v88_v4  ;;  %v1027_v35 = vpack.c.bf16 %v260_v28, %v258_v27  ;;  %v278_v4 = vld [vmem:[#allocation5 + $0x5c0] sm:$0xff] }
  0x9e   :  { %1060 = vmatpush3.bf16.msra.mxu1 %v1059_v7  ;;  %v285_v7 = vld [vmem:[#allocation5 + $0x5f8] sm:$0xff]  ;;  %v649_v28 = vld [vmem:[#allocation8] sm:$0xff] }
  0x9f   :  { %1008 = vmatpush1.bf16.msra.mxu0 %v1007_v38  ;;  %1062 = vmatprep.subr.bf16.mxu1 %v1061_v8  ;;  %v1029_v38 = vpack.c.bf16 %v265_v30, %v263_v29  ;;  %v1047_v8 = vpack.c.bf16 %v280_v5, %v278_v4  ;;  %v1049_v9 = vpack.c.bf16 %v285_v7, %v283_v6  ;;  %v650_v29 = vld [vmem:[#allocation8 + $0x8] sm:$0xff]  ;;  %v653_v59 = vld [vmem:[#allocation8 + $0x20] sm:$0xff]  ;;  %v659_v6 = vld [vmem:[#allocation8 + $0x50] sm:$0xff] }
  0xa0   :  { %1010 = vmatprep.subr.bf16.mxu0 %v1009_v39  ;;  %v262_v39 = vld [vmem:[#allocation5 + $0x540] sm:$0xff]  ;;  %v1085_v30 = vpack.c.bf16 %v650_v29, %v649_v28  ;;  %v658_v4 = vld [vmem:[#allocation8 + $0x48] sm:$0xff]  ;;  %v660_v7 = vld [vmem:[#allocation8 + $0x58] sm:$0xff] }
  0xa1   :  { %v1031_v47 = vpack.c.bf16 %v264_v40, %v262_v39  ;;  %v768_v16 = vld [vmem:[%s1391_s4] ss:$0 sm:$0xff]  ;;  %s1228_s4 = scalar_lea.vmem %s755_s10, 256 }
  0xa2   :  { %1064 = vmatpush3.bf16.msra.mxu1 %v1063_v19  ;;  %v545_v19 = vld [vmem:[#allocation7 + $0x60] sm:$0xff]  ;;  %p1229_p4 = scmp.ne.s32.totalorder %s755_s10, %s1228_s4  ;;  %p1234_p6 = scmp.lt.s32.totalorder %s1228_s4, %s1228_s4 }
  0xa3   :  { %1012 = vmatpush1.bf16.msra.mxu0 %v1011_v48  ;;  %1066 = vmatprep.subr.bf16.mxu1 %v1065_v20  ;;  %v1033_v48 = vpack.c.bf16 %v269_v42, %v267_v41  ;;  %v546_v20 = vld [vmem:[#allocation7 + $0x68] sm:$0xff] }
  0xa4   :  { %1014 = vmatprep.subr.bf16.mxu0 %v1013_v51  ;;  %v271_v51 = vld [vmem:[#allocation5 + $0x588] sm:$0xff]  ;;  %v1079_v21 = vpack.c.bf16 %v546_v20, %v545_v19  ;;  %p1235_p7 = por %p1234_p6, %p1233_p5 }
  0xa5   :  { %v1037_v55 = vpack.c.bf16 %v273_v52, %v271_v51  ;;  %v652_v51 = vld [vmem:[#allocation8 + $0x18] sm:$0xff] }
  0xa6   :  { %1068 = vmatpush3.bf16.msra.mxu1 %v1067_v31  ;;  %v1089_v57 = vpack.c.bf16 %v652_v51, %v651_v50  ;;  %p1236_p8 = pnand %p1235_p7, %p1229_p4 }
  0xa7   :  { %1016 = vmatpush1.bf16.msra.mxu0 %v1015_v62  ;;  %1070 = vmatprep.subr.bf16.mxu1 %v1069_v32  ;;  %v274_v62 = vld [vmem:[#allocation5 + $0x5a0] sm:$0xff] }
  0xa8   :  { %1018 = vmatprep.subr.bf16.mxu0 %v1017_v1  ;;  %v281_v1 = vld [vmem:[#allocation5 + $0x5d8] sm:$0xff]  ;;  %v1043_v2 = vpack.c.bf16 %v276_v63, %v274_v62 }
  0xa9   :  { %v1045_v3 = vpack.c.bf16 %v281_v1, %v279_v0  ;;  %v655_v0 = vld [vmem:[#allocation8 + $0x30] sm:$0xff]  ;;  %v656_v1 = vld [vmem:[#allocation8 + $0x38] sm:$0xff] }
  0xaa   :  { %1072 = vmatpush3.bf16.msra.mxu1 %v1071_v43 }
  0xab   :  { %1020 = vmatpush1.bf16.msra.mxu0 %v1019_v11  ;;  %1074 = vmatprep.subr.bf16.mxu1 %v1073_v44  ;;  %v284_v11 = vld [vmem:[#allocation5 + $0x5f0] sm:$0xff] }
  0xac   :  { %1022 = vmatprep.subr.bf16.mxu0 %v1021_v14  ;;  %v1051_v12 = vpack.c.bf16 %v284_v11, %v282_v10  ;;  %v93_v14 = vld [vmem:[#allocation2 + $0x58] sm:$0xff]  ;;  %v662_v10 = vld [vmem:[#allocation8 + $0x68] sm:$0xff] }
  0xae   :  { %1076 = vmatpush3.bf16.msra.mxu1 %v1075_v53 }
  0xaf   :  { %1024 = vmatpush1.bf16.msra.mxu0 %v1023_v23  ;;  %1078 = vmatprep.subr.bf16.mxu1 %v1077_v18  ;;  %v564_v23 = vld [vmem:[#allocation7 + $0xf8] sm:$0xff] }
  0xb0   :  { %1026 = vmatprep.subr.bf16.mxu0 %v1025_v26  ;;  %v1081_v24 = vpack.c.bf16 %v564_v23, %v563_v22  ;;  %v548_v26 = vld [vmem:[#allocation7 + $0x78] sm:$0xff] }
  0xb1   :  { %v1083_v27 = vpack.c.bf16 %v548_v26, %v547_v25  ;;  %v769_v26 = vld [vmem:[%s1393_s6] ss:$0 sm:$0xff] }
  0xb2   :  { %1080 = vmatpush3.bf16.msra.mxu1 %v1079_v21 }
  0xb3   :  { %1028 = vmatpush1.bf16.msra.mxu0 %v1027_v35  ;;  %1082 = vmatprep.subr.bf16.mxu1 %v1081_v24  ;;  %v288_v35 = vlaneseq }
  0xb4   :  { %1030 = vmatprep.subr.bf16.mxu0 %v1029_v38  ;;  %v286_v38 = vld [vmem:[%s1389_s2] sm:$0x3] }
  0xb5   :  { %v289_v36 = vshrl.u32 %v288_v35, 7 }
  0xb6   :  { %1084 = vmatpush3.bf16.msra.mxu1 %v1083_v27 }
  0xb7   :  { %1032 = vmatpush1.bf16.msra.mxu0 %v1031_v47  ;;  %1086 = vmatprep.subr.bf16.mxu1 %v1085_v30  ;;  %v290_v37 = vsub.s32 0, %v289_v36  ;;  %v294_v39 = vsub.s32 1, %v289_v36 }
  0xb8   :  { %1034 = vmatprep.subr.bf16.mxu0 %v1033_v48 }
  0xb9   :  { %v291_v40 = vrot.slane %v286_v38, %v290_v37  ;;  %v295_v41 = vrot.slane %v286_v38, %v294_v39 }
  0xbb   :  { %1036 = vmatpush1.bf16.msra.mxu0 %v1035_v54 }
  0xbc   :  { %1038 = vmatprep.subr.bf16.mxu0 %v1037_v55 }
  0xbf   :  { %1040 = vmatpush1.bf16.msra.mxu0 %v1039_v60  ;;  %v654_v60 = vld [vmem:[#allocation8 + $0x28] sm:$0xff] }
  0xc0   :  { %1042 = vmatprep.subr.bf16.mxu0 %v1041_v61  ;;  %v1093_v63 = vpack.c.bf16 %v654_v60, %v653_v59 }
  0xc3   :  { %1044 = vmatpush1.bf16.msra.mxu0 %v1043_v2  ;;  %v1097_v2 = vpack.c.bf16 %v656_v1, %v655_v0 }
  0xc4   :  { %1046 = vmatprep.subr.bf16.mxu0 %v1045_v3  ;;  %v657_v3 = vld [vmem:[#allocation8 + $0x40] sm:$0xff] }
  0xc5   :  { %v1101_v5 = vpack.c.bf16 %v658_v4, %v657_v3 }
  0xc7   :  { %1048 = vmatpush1.bf16.msra.mxu0 %v1047_v8  ;;  %v1105_v8 = vpack.c.bf16 %v660_v7, %v659_v6 }
  0xc8   :  { %1050 = vmatprep.subr.bf16.mxu0 %v1049_v9  ;;  %v661_v9 = vld [vmem:[#allocation8 + $0x60] sm:$0xff] }
  0xc9   :  { %v1109_v11 = vpack.c.bf16 %v662_v10, %v661_v9 }
  0xcb   :  { %1052 = vmatpush1.bf16.msra.mxu0 %v1051_v12  ;;  %v663_v12 = vld [vmem:[#allocation8 + $0x70] sm:$0xff] }
  0xce   :  { %517 = vmatmul.mubr.f32.vlgmr.msra.gmra.mrb[0].mxu0 %v86_v13  ;;  %v664_v13 = vld [vmem:[#allocation8 + $0x78] sm:$0xff] }
  0xcf   :  { %522 = vmatprep.mubr.f32.mxu0 %v93_v14  ;;  %v1113_v14 = vpack.c.bf16 %v664_v13, %v663_v12 }
  0xd2   :  { %523 = vmatmul.mubr.f32.gmra.mrb[2].mxu0 %v92_v15 }
 0x16c   :  { %v364_v31 = vpop.f32.mrb[0].mxu1 }
 0x16d   :  { %v366_v32 = vpop.f32.mrb[1].mxu1  ;;  %v365_v42 = vadd.f32 %v364_v31, %v291_v40 }
 0x16e   :  { %v367_v43 = vadd.f32 %v366_v32, %v295_v41 }
 0x170   :  { %v370_v33 = vpop.f32.mrb[2].mxu1 }
 0x171   :  { %v372_v34 = vpop.f32.mrb[3].mxu1  ;;  %v371_v46 = vadd.f32 %v370_v33, %v291_v40 }
 0x172   :  { %v373_v49 = vadd.f32 %v372_v34, %v295_v41 }
 0x1a1   :  { %v518_v44 = vpop.f32.mrb[0].mxu0 }
 0x1a2   :  { %v1118_v45 = vadd.f32 %v518_v44, %v365_v42  ;;  %v520_v47 = vpop.f32.mrb[1].mxu0 }
 0x1a3   :  { %v1120_v48 = vadd.f32 %v520_v47, %v367_v43 }
 0x1a4   :  { %v529_v54 = vmax.f32 %v1118_v45, 0.0 }
 0x1a5   :  { %v530_v52 = vmax.f32 %v1120_v48, 0.0  ;;  %v524_v53 = vpop.f32.mrb[2].mxu0 }
 0x1a6   :  { %v1122_v55 = vadd.f32 %v524_v53, %v371_v46  ;;  %v526_v56 = vpop.f32.mrb[3].mxu0 }
 0x1a7   :  { %v1124_v58 = vadd.f32 %v526_v56, %v373_v49  ;;  %636 = vmatprep.mubr.f32.mxu1 %v530_v52 }
 0x1a8   :  { %637 = vmatmul.mubr.f32.vlgmr.msra.gmra.mrb[4].mxu1 %v529_v54  ;;  %v531_v62 = vmax.f32 %v1122_v55, 0.0 }
 0x1a9   :  { %v532_v61 = vmax.f32 %v1124_v58, 0.0  ;;  %1088 = vmatpush3.bf16.msra.mxu1 %v1085_v30 }
 0x1aa   :  { %1090 = vmatprep.subr.bf16.mxu1 %v1089_v57 }
 0x1ab   :  { %641 = vmatprep.mubr.f32.mxu1 %v532_v61 }
 0x1ac   :  { %642 = vmatmul.mubr.f32.gmra.mrb[6].mxu1 %v531_v62 }
 0x1ad   :  { %1092 = vmatpush3.bf16.msra.mxu1 %v1089_v57 }
 0x1ae   :  { %1094 = vmatprep.subr.bf16.mxu1 %v1093_v63 }
 0x1b1   :  { %1096 = vmatpush3.bf16.msra.mxu1 %v1093_v63 }
 0x1b2   :  { %1098 = vmatprep.subr.bf16.mxu1 %v1097_v2 }
 0x1b5   :  { %1100 = vmatpush3.bf16.msra.mxu1 %v1097_v2 }
 0x1b6   :  { %1102 = vmatprep.subr.bf16.mxu1 %v1101_v5 }
 0x1b9   :  { %1104 = vmatpush3.bf16.msra.mxu1 %v1101_v5 }
 0x1ba   :  { %1106 = vmatprep.subr.bf16.mxu1 %v1105_v8 }
 0x1bd   :  { %1108 = vmatpush3.bf16.msra.mxu1 %v1105_v8 }
 0x1be   :  { %1110 = vmatprep.subr.bf16.mxu1 %v1109_v11 }
 0x1c1   :  { %1112 = vmatpush3.bf16.msra.mxu1 %v1109_v11 }
 0x1c2   :  { %1114 = vmatprep.subr.bf16.mxu1 %v1113_v14 }
 0x1c5   :  { %1116 = vmatpush3.bf16.msra.mxu1 %v1113_v14 }
 0x27b   :  { %v802_v15 = vpop.f32.mrb[4].mxu1 }
 0x27c   :  { %v803_v17 = vpop.f32.mrb[5].mxu1 }
 0x27d   :  { %v804_v18 = vadd.f32 %v803_v17, %v802_v15 }
 0x27f   :  { %v639_v19 = vadd.f32 %v804_v18, %v768_v16  ;;  %v805_v20 = vpop.f32.mrb[6].mxu1 }
 0x280   :  { %v806_v21 = vpop.f32.mrb[7].mxu1 }
 0x281   :  { %v647_v22 = vmax.f32 %v639_v19, 0.0  ;;  %v807_v23 = vadd.f32 %v806_v21, %v805_v20 }
 0x283   :  { %v644_v24 = vadd.f32 %v807_v23, %v768_v16  ;;  %858 = vmatprep.mubr.f32.mxu1 %v647_v22 }
 0x285   :  { %v648_v25 = vmax.f32 %v644_v24, 0.0 }
 0x287   :  { %859 = vmatmul.mubr.f32.vlgmr.msra.gmra.mrb[8].mxu1 %v648_v25 }
 0x35a   :  { %v860_v27 = vpop.f32.mrb[8].mxu1 }
 0x35b   :  { %v744_v28 = vadd.f32 %v860_v27, %v769_v26  ;;  %v738_v29 = vpop.f32.mrb[9].mxu1 }
 0x35c   :  { %v739_v30 = vadd.f32 %v769_v26, %v738_v29 }
 0x35d   :  { %748 = vst [vmem:[#allocation10 + $0x8] sm:$0xff] %v744_v28 }
 0x35e   :  { %747 = vst [vmem:[#allocation10] sm:$0xff] %v739_v30 }
 0x35f   :  { %1239 = shalt.err (!%p1236_p8)
}
 0x360   :  { %s1240_s6 = scalar_lea.hbm %s1394_s7, 256 }
 0x361   :  { %p1241_p9 = scmp.ne.s32.totalorder %s1394_s7, %s1240_s6  ;;  %p1244_p10 = scmp.lt.u32.totalorder %s1240_s6, %s1394_s7 }
 0x363   :  { %p1246_p11 = pnand %p1244_p10, %p1241_p9 }
 0x365   :  { %1249 = shalt.err (!%p1246_p11)
}
 0x366   :  { %760 = dma.vmem_to_hbm [thread:$0]  %s755_s10, 256, %s1394_s7, [#allocation4], %s1265_s0, %s1265_s0, %s1266_s15  }
 0x367   :  { %1256 = dma.done.wait [#allocation4], 256  }
 0x368   :  { %1257 = vsyncadd [#allocation4], 4294967040 }
 0x369   :  { %764 = vsyncpa [#allocation3], 1 }
 0x36a   :  { %765 = vsyncpa [#allocation6], 1 }
 0x36b   :  { %766 = vsyncpa [#allocation9], 1 }
 0x36c   :  { %767 = vsyncpa [#allocation4], 1 }

</bundles_post_ra>
